<compile_context>
chip_gen: v6e
topology: v6e:2x2x1
jax: 0.10.0
libtpu: 0.0.40
codegen_flags: <defaults>
</compile_context>

<pallas_src>
import math

import jax
import jax.numpy as jnp
from jax.experimental import pallas as pl
from jax.experimental.pallas import tpu as pltpu

TB_ALIGN = 16   # batch-tile alignment (covers f32 (8) and bf16 (16) sublane packing)


def _cdiv(a, b):
    return -(-a // b)


def _round_up(x, m):
    return _cdiv(x, m) * m


def _softplus(x):
    # Numerically stable softplus (safe for large positive rho as well).
    return jnp.maximum(x, 0.0) + jnp.log1p(jnp.exp(-jnp.abs(x)))


def _device_kind():
    try:
        return jax.devices()[0].device_kind.lower()
    except Exception:
        return ""


def _lane_multiple():
    k = _device_kind()
    # v6e / v7x MXU is 2x256x256 -> pad feature dims to 256; 128 elsewhere.
    return 256 if ("v6" in k or "v7" in k) else 128


def _vmem_cap_bytes():
    k = _device_kind()
    if "v7" in k:
        return 48 << 20      # 64 MiB physical: leave compiler scratch headroom
    if "v5" in k or "v6" in k:
        return 100 << 20     # 128 MiB physical
    return 64 << 20


def _const_spec(shape):
    """BlockSpec for an operand that is identical for every grid step.

    Single-buffered (fetched once, kept resident).  Falls back to the default
    double-buffered spec if this jax version lacks pipeline_mode/Buffered.
    """
    idx = lambda i: (0, 0)
    try:
        return pl.BlockSpec(shape, idx, pipeline_mode=pl.Buffered(1))
    except (TypeError, AttributeError):
        return pl.BlockSpec(shape, idx)


def bayesian_mlp_kernel(x_ref, w1_ref, b1_ref, wb_ref, w2_ref, b2_ref, out_ref):
    cd = w1_ref.dtype  # MXU operand dtype (bf16 or f32)

    # fc1 + ReLU (f32 accumulation, f32 bias add / activation).
    h1 = jnp.dot(x_ref[...], w1_ref[...], preferred_element_type=jnp.float32)
    h1 = jnp.maximum(h1 + b1_ref[...], 0.0)

    # Bayesian linear (weight prebuilt outside the kernel), no bias, ReLU.
    h2 = jnp.dot(h1.astype(cd), wb_ref[...], preferred_element_type=jnp.float32)
    h2 = jnp.maximum(h2, 0.0)

    # fc2 (bias, no activation), lane-dense f32 output store.
    out = jnp.dot(h2.astype(cd), w2_ref[...], preferred_element_type=jnp.float32)
    out_ref[...] = out + b2_ref[...]


def prepare_params(params, compute_dtype=jnp.bfloat16, lane=None):
    """Build the Bayesian weight once in f32, pad feature dims to the MXU lane
    multiple, and cast matmul operands to compute_dtype.

    Zero padding is semantics-preserving: padded hidden/output units have zero
    weights and biases everywhere, so they contribute nothing to the real
    output columns, which are sliced out by the caller.
    """
    if lane is None:
        lane = _lane_multiple()
    in_size, hidden = params["w1"].shape
    out_size = params["w2"].shape[1]
    hp = _round_up(hidden, lane)
    op = _round_up(out_size, lane)

    # Bayesian weight built in full f32 precision (matches the PyTorch module);
    # only the final W is cast to the MXU operand dtype.
    w_bayes = params["mean_t"] + _softplus(params["rho_t"]) * params["eps_t"]

    def pad2(a, rows, cols):
        return jnp.pad(a, ((0, rows - a.shape[0]), (0, cols - a.shape[1])))

    return {
        "w1": pad2(params["w1"], in_size, hp).astype(compute_dtype),
        "b1": pad2(params["b1"], 1, hp).astype(jnp.float32),
        "w_bayes": pad2(w_bayes, hp, hp).astype(compute_dtype),
        "w2": pad2(params["w2"], hp, op).astype(compute_dtype),
        "b2": pad2(params["b2"], 1, op).astype(jnp.float32),
    }


def bayesian_mlp(x, dev_params, out_size, *, block_b=512):
    """x: [B, input_size] f32. dev_params: output of prepare_params()."""
    compute_dtype = dev_params["w1"].dtype
    B, in_size = x.shape
    hp = dev_params["w1"].shape[1]
    op = dev_params["w2"].shape[1]

    # Batch tiling: aim for >= 4 tiles so both v7x TensorCores are fed and the
    # streamed x/out DMAs have something to double-buffer against.
    tb = min(block_b, max(TB_ALIGN, _round_up(_cdiv(B, 4), TB_ALIGN)))
    bp = _round_up(B, tb)
    if bp != B:
        x = jnp.pad(x, ((0, bp - B), (0, 0)))
    x = x.astype(compute_dtype)
    num_tiles = bp // tb

    def nbytes(shape, dtype):
        return math.prod(shape) * jnp.dtype(dtype).itemsize

    cdb = jnp.dtype(compute_dtype).itemsize
    # Resident, single-buffered weights + biases.
    weight_bytes = (nbytes((in_size, hp), compute_dtype)
                    + nbytes((hp, hp), compute_dtype)
                    + nbytes((hp, op), compute_dtype)
                    + nbytes((1, hp), jnp.float32)
                    + nbytes((1, op), jnp.float32))
    # Streamed, double-buffered tiles (x in, out out).
    act_bytes = 2 * (nbytes((tb, in_size), compute_dtype)
                     + nbytes((tb, op), jnp.float32))
    # In-kernel temporaries: h1/h2 f32 + their compute-dtype casts + f32 out.
    tmp_bytes = 2 * tb * hp * (4 + cdb) + tb * op * 4
    vmem_bytes = weight_bytes + act_bytes + tmp_bytes + (4 << 20)
    vmem_bytes = int(min(max(vmem_bytes, 32 << 20), _vmem_cap_bytes()))

    flops = 2 * bp * (in_size * hp + hp * hp + hp * op) + bp * (3 * hp + 2 * op)
    bytes_accessed = (nbytes((bp, in_size), compute_dtype) + weight_bytes
                      + nbytes((bp, op), jnp.float32))

    out = pl.pallas_call(
        bayesian_mlp_kernel,
        out_shape=jax.ShapeDtypeStruct((bp, op), jnp.float32),
        grid_spec=pltpu.PrefetchScalarGridSpec(
            num_scalar_prefetch=0,
            grid=(num_tiles,),
            in_specs=[
                pl.BlockSpec((tb, in_size), lambda i: (i, 0)),  # x: streamed on B
                _const_spec((in_size, hp)),                     # w1: resident
                _const_spec((1, hp)),                           # b1
                _const_spec((hp, hp)),                          # w_bayes
                _const_spec((hp, op)),                          # w2
                _const_spec((1, op)),                           # b2
            ],
            out_specs=pl.BlockSpec((tb, op), lambda i: (i, 0)),
        ),
        compiler_params=pltpu.CompilerParams(
            dimension_semantics=("parallel",),     # megacore on v7x
            vmem_limit_bytes=vmem_bytes,
        ),
        cost_estimate=pl.CostEstimate(
            flops=flops,
            transcendentals=0,                     # softplus hoisted out of kernel
            bytes_accessed=bytes_accessed,
        ),
    )(x, dev_params["w1"], dev_params["b1"], dev_params["w_bayes"],
      dev_params["w2"], dev_params["b2"])

    return out[:B, :out_size]


def init_params(key, input_size, hidden_size, output_size):
    """Parameter init mimicking the PyTorch module's shapes (transposed to
    [in, out] so the kernel does x @ W). eps plays the role of the per-forward
    `self.eps.data.normal_()` sample."""
    k1, k2, k3, k4, k5, k6 = jax.random.split(key, 6)

    def kaiming_uniform(k, fan_in, shape):
        bound = 1.0 / jnp.sqrt(fan_in)
        return jax.random.uniform(k, shape, jnp.float32, -bound, bound)

    w1 = kaiming_uniform(k1, input_size, (input_size, hidden_size))
    b1 = kaiming_uniform(k2, input_size, (1, hidden_size))
    mean_t = kaiming_uniform(k3, hidden_size, (hidden_size, hidden_size))
    rho_t = jnp.full((hidden_size, hidden_size), -5.0, dtype=jnp.float32)
    eps_t = jax.random.normal(k4, (hidden_size, hidden_size), jnp.float32)
    w2 = kaiming_uniform(k5, hidden_size, (hidden_size, output_size))
    b2 = kaiming_uniform(k6, hidden_size, (1, output_size))

    return {"w1": w1, "b1": b1, "mean_t": mean_t, "rho_t": rho_t,
            "eps_t": eps_t, "w2": w2, "b2": b2}


def reference_forward(x, p, compute_dtype=jnp.float32):
    """Pure-JAX reference with identical casting semantics to the kernel path
    (Bayesian weight always built in f32, only the final W cast down)."""
    cd = compute_dtype
    h1 = jnp.dot(x.astype(cd), p["w1"].astype(cd),
                 preferred_element_type=jnp.float32)
    h1 = jnp.maximum(h1 + p["b1"], 0.0)
    w_b = (p["mean_t"] + _softplus(p["rho_t"]) * p["eps_t"]).astype(cd)
    h2 = jnp.maximum(jnp.dot(h1.astype(cd), w_b,
                             preferred_element_type=jnp.float32), 0.0)
    out = jnp.dot(h2.astype(cd), p["w2"].astype(cd),
                  preferred_element_type=jnp.float32)
    return out + p["b2"]


if __name__ == "__main__":
    key = jax.random.PRNGKey(0)
    kx, kp = jax.random.split(key)

    batch, input_size, hidden_size, output_size = 40, 32, 32, 16

    x = jax.random.normal(kx, (batch, input_size), jnp.float32)
    params = init_params(kp, input_size, hidden_size, output_size)

    # bf16 MXU operands (the performance path on v5e/v6e/v7x); small batch tile
    # so the multi-step grid, batch padding and lane padding paths are all
    # exercised.
    dev_bf16 = prepare_params(params, jnp.bfloat16)
    out_bf16 = bayesian_mlp(x, dev_bf16, output_size, block_b=16)
    out_bf16 = jax.block_until_ready(out_bf16)
    ref_bf16 = reference_forward(x, params, jnp.bfloat16)
    assert out_bf16.shape == (batch, output_size)
    assert jnp.allclose(out_bf16, ref_bf16, atol=2e-2, rtol=2e-2)

    # f32 path: exact semantics of the original PyTorch module (debug only).
    dev_f32 = prepare_params(params, jnp.float32)
    out_f32 = bayesian_mlp(x, dev_f32, output_size, block_b=16)
    out_f32 = jax.block_until_ready(out_f32)
    ref_f32 = reference_forward(x, params, jnp.float32)
    assert out_f32.shape == (batch, output_size)
    assert jnp.allclose(out_f32, ref_f32, atol=1e-4, rtol=1e-4)

    print("KERNEL_OK")
</pallas_src>

<mosaic_0001>
module attributes {stable_mosaic.version = 11 : i64} {
  func.func @bayesian_mlp_kernel(%arg0: i32, %arg1: memref<16x32xbf16, #tpu.memory_space<vmem>>, %arg2: memref<32x128xbf16, #tpu.memory_space<vmem>>, %arg3: memref<1x128xf32, #tpu.memory_space<vmem>>, %arg4: memref<128x128xbf16, #tpu.memory_space<vmem>>, %arg5: memref<128x128xbf16, #tpu.memory_space<vmem>>, %arg6: memref<1x128xf32, #tpu.memory_space<vmem>>, %arg7: memref<16x128xf32, #tpu.memory_space<vmem>>) attributes {dimension_semantics = [#tpu.dimension_semantics<parallel>], iteration_bounds = array<i64: 3>, scalar_prefetch = 0 : i64, scratch_operands = 0 : i64, tpu.core_type = #tpu.core_type<tc>, window_params = [{transform_indices = @transform_0, window_bounds = array<i64: 16, 32>}, {pipeline_mode = #tpu.pipeline_mode<synchronous>, transform_indices = @transform_1, window_bounds = array<i64: 32, 128>}, {pipeline_mode = #tpu.pipeline_mode<synchronous>, transform_indices = @transform_2, window_bounds = array<i64: 1, 128>}, {pipeline_mode = #tpu.pipeline_mode<synchronous>, transform_indices = @transform_3, window_bounds = array<i64: 128, 128>}, {pipeline_mode = #tpu.pipeline_mode<synchronous>, transform_indices = @transform_4, window_bounds = array<i64: 128, 128>}, {pipeline_mode = #tpu.pipeline_mode<synchronous>, transform_indices = @transform_5, window_bounds = array<i64: 1, 128>}, {transform_indices = @transform_6, window_bounds = array<i64: 16, 128>}]} {
    %c0 = arith.constant 0 : index
    %c0_0 = arith.constant 0 : index
    %0 = vector.load %arg1[%c0, %c0_0] : memref<16x32xbf16, #tpu.memory_space<vmem>>, vector<16x32xbf16>
    %c0_1 = arith.constant 0 : index
    %c0_2 = arith.constant 0 : index
    %1 = vector.load %arg2[%c0_1, %c0_2] : memref<32x128xbf16, #tpu.memory_space<vmem>>, vector<32x128xbf16>
    %cst = arith.constant dense<0.000000e+00> : vector<16x128xf32>
    %2 = tpu.matmul %0, %1, %cst {dimension_numbers = #tpu.dot_dimension_numbers<[1], [0], [0], [1], [0, 0, 1, 1], [], []>} : vector<16x32xbf16>, vector<32x128xbf16>, vector<16x128xf32> -> vector<16x128xf32>
    %c0_3 = arith.constant 0 : index
    %c0_4 = arith.constant 0 : index
    %3 = vector.load %arg3[%c0_3, %c0_4] : memref<1x128xf32, #tpu.memory_space<vmem>>, vector<1x128xf32>
    %4 = vector.broadcast %3 : vector<1x128xf32> to vector<16x128xf32>
    %5 = arith.addf %2, %4 : vector<16x128xf32>
    %cst_5 = arith.constant 0.000000e+00 : f32
    %6 = vector.broadcast %cst_5 : f32 to vector<16x128xf32>
    %7 = arith.maximumf %5, %6 : vector<16x128xf32>
    %8 = arith.truncf %7 : vector<16x128xf32> to vector<16x128xbf16>
    %c0_6 = arith.constant 0 : index
    %c0_7 = arith.constant 0 : index
    %9 = vector.load %arg4[%c0_6, %c0_7] : memref<128x128xbf16, #tpu.memory_space<vmem>>, vector<128x128xbf16>
    %cst_8 = arith.constant dense<0.000000e+00> : vector<16x128xf32>
    %10 = tpu.matmul %8, %9, %cst_8 {dimension_numbers = #tpu.dot_dimension_numbers<[1], [0], [0], [1], [0, 0, 1, 1], [], []>} : vector<16x128xbf16>, vector<128x128xbf16>, vector<16x128xf32> -> vector<16x128xf32>
    %cst_9 = arith.constant 0.000000e+00 : f32
    %11 = vector.broadcast %cst_9 : f32 to vector<16x128xf32>
    %12 = arith.maximumf %10, %11 : vector<16x128xf32>
    %13 = arith.truncf %12 : vector<16x128xf32> to vector<16x128xbf16>
    %c0_10 = arith.constant 0 : index
    %c0_11 = arith.constant 0 : index
    %14 = vector.load %arg5[%c0_10, %c0_11] : memref<128x128xbf16, #tpu.memory_space<vmem>>, vector<128x128xbf16>
    %cst_12 = arith.constant dense<0.000000e+00> : vector<16x128xf32>
    %15 = tpu.matmul %13, %14, %cst_12 {dimension_numbers = #tpu.dot_dimension_numbers<[1], [0], [0], [1], [0, 0, 1, 1], [], []>} : vector<16x128xbf16>, vector<128x128xbf16>, vector<16x128xf32> -> vector<16x128xf32>
    %c0_13 = arith.constant 0 : index
    %c0_14 = arith.constant 0 : index
    %16 = vector.load %arg6[%c0_13, %c0_14] : memref<1x128xf32, #tpu.memory_space<vmem>>, vector<1x128xf32>
    %17 = vector.broadcast %16 : vector<1x128xf32> to vector<16x128xf32>
    %18 = arith.addf %15, %17 : vector<16x128xf32>
    %c0_15 = arith.constant 0 : index
    %c0_16 = arith.constant 0 : index
    %19 = vector.load %arg7[%c0_15, %c0_16] : memref<16x128xf32, #tpu.memory_space<vmem>>, vector<16x128xf32>
    tpu.vector_store %arg7[%c0_15, %c0_16], %18 {strides = array<i32>} : memref<16x128xf32, #tpu.memory_space<vmem>>, vector<16x128xf32>,
    return
  }
  func.func @transform_0(%arg0: i32) -> (i32, i32) {
    %c0_i32 = arith.constant 0 : i32
    %c0_i32_0 = arith.constant 0 : i32
    return %arg0, %c0_i32 : i32, i32
  }
  func.func @transform_1(%arg0: i32) -> (i32, i32) {
    %c0_i32 = arith.constant 0 : i32
    %c0_i32_0 = arith.constant 0 : i32
    %c0_i32_1 = arith.constant 0 : i32
    return %c0_i32, %c0_i32_0 : i32, i32
  }
  func.func @transform_2(%arg0: i32) -> (i32, i32) {
    %c0_i32 = arith.constant 0 : i32
    %c0_i32_0 = arith.constant 0 : i32
    %c0_i32_1 = arith.constant 0 : i32
    return %c0_i32, %c0_i32_0 : i32, i32
  }
  func.func @transform_3(%arg0: i32) -> (i32, i32) {
    %c0_i32 = arith.constant 0 : i32
    %c0_i32_0 = arith.constant 0 : i32
    %c0_i32_1 = arith.constant 0 : i32
    return %c0_i32, %c0_i32_0 : i32, i32
  }
  func.func @transform_4(%arg0: i32) -> (i32, i32) {
    %c0_i32 = arith.constant 0 : i32
    %c0_i32_0 = arith.constant 0 : i32
    %c0_i32_1 = arith.constant 0 : i32
    return %c0_i32, %c0_i32_0 : i32, i32
  }
  func.func @transform_5(%arg0: i32) -> (i32, i32) {
    %c0_i32 = arith.constant 0 : i32
    %c0_i32_0 = arith.constant 0 : i32
    %c0_i32_1 = arith.constant 0 : i32
    return %c0_i32, %c0_i32_0 : i32, i32
  }
  func.func @transform_6(%arg0: i32) -> (i32, i32) {
    %c0_i32 = arith.constant 0 : i32
    %c0_i32_0 = arith.constant 0 : i32
    return %arg0, %c0_i32 : i32, i32
  }
}

</mosaic_0001>

<bundles_post_ra>
// kernel: tpu_custom_call.1
= control target key start
LH: loop header
LB: loop body
LE: loop exit
PB: predicated region body
PF: predicated region fallthrough
CT: control target
= control target key end

     0   :  { %11 = vsyncpa [#allocation3], 0  ;;  %s1219_s0 = inlined_call_operand.vmem [shape: bf16[48,32], index: 0, kind: input, shape index: {}]   ;;  %s1220_s1 = inlined_call_operand.vmem [shape: bf16[32,128], index: 1, kind: input, shape index: {}]   ;;  %s1221_s2 = inlined_call_operand.vmem [shape: f32[1,128], index: 2, kind: input, shape index: {}]   ;;  %s1222_s3 = inlined_call_operand.hbm [shape: bf16[128,128], index: 3, kind: input, shape index: {}]   ;;  %s1223_s4 = inlined_call_operand.hbm [shape: bf16[128,128], index: 4, kind: input, shape index: {}]   ;;  %s1224_s5 = inlined_call_operand.vmem [shape: f32[1,128], index: 5, kind: input, shape index: {}]   ;;  %s1225_s6 = inlined_call_operand.hbm [shape: f32[48,128], index: 6, kind: output, shape index: {}]  }
   0x1   :  { %12 = vsyncpa [#allocation6], 0 }
   0x2   :  { %13 = vsyncpa [#allocation4], 0 }
   0x3   :  { %15 = vsyncpa [#allocation4 + $0x1], 0  ;;  %s1041_s21 = smov 0   ;;  %s1043_s22 = smov 0  }
   0x4   :  { %s1045_s23 = smov 0   ;;  %s1047_s24 = smov 0  }
   0x5 LB: > { %s1062_s25 = sadd.s32 4294967295, %s995_s24   ;;  %s682_s26 = sadd.s32 4294967294, %s995_s24   ;;  %s995_s24 = sphi %s1047_s24, %s1239_s24   ;;  %s991_s23 = sphi %s1045_s23, %s1238_s23   ;;  %s987_s22 = sphi %s1043_s22, %s1237_s22   ;;  %s983_s21 = sphi %s1041_s21, %s1236_s21  }
   0x6   : > { %s1066_s27 = sadd.s32 1, %s995_s24   ;;  %s159_s28 = sadd.s32 1, %s991_s23 }
   0x7   : > { %s156_s29 = ssub.s32 %s995_s24, %s1066_s27  ;;  %p169_p0 = scmp.ne.s32.totalorder %s991_s23, %s987_s22 }
   0x8   : > { %p157_p1 = scmp.eq.s32.totalorder %s156_s29, 0  ;;  %p170_p2 = scmp.eq.s32.totalorder %s1062_s25, 2 }
   0x9   : > { %p175_p3 = scmp.ne.s32.totalorder %s987_s22, %s983_s21  ;;  %p176_p4 = scmp.eq.s32.totalorder %s682_s26, 2 }
   0xa   : > { %s1077_s30 = scalar_select %p157_p1, %s991_s23, %s159_s28  }
   0xb   : > { %p1079_p5 = por %p170_p2, %p169_p0  ;;  %p1083_p6 = por %p176_p4, %p175_p3 }
   0xc   : > { %p683_p7 = scmp.ge.s32.totalorder %s995_s24, 1  ;;  %p183_p8 = scmp.lt.s32.totalorder %s995_s24, 4 }
   0xd   : > { %s1228_s8 = scalar_select %p1083_p6, 1, 0 }
   0xe   : > { %p1226_p9 = scmp.eq.s32.totalorder %s1062_s25, 0  ;;  %p1090_p10 = pnand %p683_p7, %p183_p8 }
   0xf   : > { %s997_s10 = smov [#allocation2]   ;;  %s998_s13 = smov [#allocation5]  }
  0x10   : > { %s201_s11 = sshll.u32 %s997_s10, 4  ;;  %p800_p11 = pneg %p1090_p10  ;;  %s202_s11 = int_to_ptr.vmem [resolvable:$true] %s201_s11 }
  0x11   : > { %s214_s14 = sshll.u32 %s998_s13, 4  ;;  %s886_s15 = scalar_lea.vmem %s202_s11, 1024  ;;  %s215_s14 = int_to_ptr.vmem [resolvable:$true] %s214_s14 }
  0x12   : > { %p1098_p12 = pnand %p1226_p9, %p800_p11  ;;  %p887_p0 = scmp.ne.s32.totalorder %s202_s11, %s886_s15 }
  0x13   : > { %p894_p3 = scmp.lt.s32.totalorder %s202_s11, %s202_s11  ;;  %p895_p4 = scmp.lt.s32.totalorder %s886_s15, %s886_s15 }
  0x14   : > { %p877_p13 = pneg %p1098_p12 }
  0x15   : > { %p896_p7 = por %p895_p4, %p894_p3 }
  0x16   : > { %p889_p1 = pnand %p887_p0, %p877_p13 }
  0x18   : > { %p890_p2 = pneg %p889_p1 }
  0x1a   : > { %p897_p8 = pnand %p896_p7, %p890_p2 }
  0x1c   : > { %900 = shalt.err (!%p897_p8)
}
  0x1d   : > { %s999_s16 = smov 64   ;;  %s1000_s17 = smov 4  }
  0x1e   : > { %803 = dma.hbm_to_vmem [thread:$0]  (!%p1098_p12), %s1222_s3, 1024, %s202_s11, [#allocation3], %s999_s16, %s999_s16, %s1000_s17  }
  0x1f   : > { %s912_s20 = scalar_lea.vmem %s215_s14, 1024  ;;  %p920_p9 = scmp.lt.s32.totalorder %s215_s14, %s215_s14 }
  0x20   : > { %p913_p11 = scmp.ne.s32.totalorder %s215_s14, %s912_s20  ;;  %p921_p6 = scmp.lt.s32.totalorder %s912_s20, %s912_s20 }
  0x22   : > { %p915_p0 = pnand %p913_p11, %p877_p13  ;;  %p922_p3 = por %p921_p6, %p920_p9 }
  0x24   : > { %p916_p1 = pneg %p915_p0 }
  0x26   : > { %p923_p2 = pnand %p922_p3, %p916_p1 }
  0x28   : > { %926 = shalt.err (!%p923_p2)
}
  0x29   : > { %806 = dma.hbm_to_vmem [thread:$0]  (!%p1098_p12), %s1223_s4, 1024, %s215_s14, [#allocation6], %s999_s16, %s999_s16, %s1000_s17  }
  0x2a   : > { %242 = sbr.rel (%p1090_p10) target bundleno = 678 (0x2a6), region = 44  ;;  %p1231_p4 = scmp.eq.s32.totalorder (!%p1090_p10), %s1062_s25, 0 }
  0x2f   : > { %970 = dma.done.wait (%p1231_p4), [#allocation3], 1024   ;;  %p1232_p13 = pmov %p1231_p4 }
  0x30   : > { %p1233_p7 = pmov %p1231_p4 }
  0x31   : > { %972 = vsyncadd (%p1232_p13), [#allocation3], 4294966272 }
  0x32   : > { %974 = dma.done.wait (%p1233_p7), [#allocation6], 1024   ;;  %p1234_p6 = pmov %p1231_p4 }
  0x33   : > { %s691_s29 = sshll.u32 %s1062_s25, 1  ;;  %v1001_v0 = vmov 0.0   ;;  %vm1002_vm0 = vmmov 0   ;;  %v856_v1 = vld [vmem:[%s1220_s1 + $0x8] sm:$0xff]   ;;  %v857_v2 = vld [vmem:[%s1220_s1] sm:$0xff]   ;;  %v859_v3 = vld [vmem:[#allocation2 + $0x38] sm:$0xff]  }
  0x34   : > { %976 = vsyncadd (%p1234_p6), [#allocation6], 4294966272  ;;  %742 = vmatprep.subr.bf16.mxu0 %v1001_v0  ;;  %746 = vmatprep.mubr.msk.bf16.mxu0 %vm1002_vm0, %v1001_v0  ;;  %p277_p9 = scmp.lt.s32.totalorder %s691_s29, 5  ;;  %v860_v5 = vld [vmem:[#allocation2 + $0x30] sm:$0xff]   ;;  %vm314_vm1 = vcmask 261120   ;;  %v861_v6 = vld [vmem:[#allocation2 + $0x28] sm:$0xff]  }
  0x35   : > { %750 = vmatprep.subr.bf16.mxu1 %v1001_v0  ;;  %766 = vmatprep.mubr.msk.bf16.mxu1 %vm1002_vm0, %v1001_v0  ;;  %v862_v7 = vld [vmem:[#allocation2 + $0x20] sm:$0xff]   ;;  %v863_v8 = vld [vmem:[#allocation2 + $0x18] sm:$0xff]   ;;  %v864_v9 = vld [vmem:[#allocation2 + $0x10] sm:$0xff]   ;;  %s273_s19 = sand.u32 1, %s987_s22   ;;  %s720_s10 = sshll.u32 %s1062_s25, 8 }
  0x36   : > { %s1241_s29 = smov (!%p277_p9, %s691_s29), 5  ;;  %743 = vmatpush3.bf16.msra.mxu0 %v856_v1  ;;  %751 = vmatpush3.bf16.msra.mxu1 %v859_v3  ;;  %v865_v10 = vld [vmem:[#allocation2 + $0x8] sm:$0xff]   ;;  %v866_v11 = vld [vmem:[#allocation2] sm:$0xff]   ;;  %v867_v12 = vld [vmem:[#allocation5 + $0x38] sm:$0xff]   ;;  %s690_s20 = sshll.u32 %s273_s19, 4 }
  0x37   : > { %s692_s9 = sshll.u32 %s1241_s29, 2  ;;  %744 = vmatprep.subr.bf16.mxu0 %v1001_v0  ;;  %752 = vmatprep.subr.bf16.mxu1 %v1001_v0  ;;  %v868_v13 = vld [vmem:[#allocation5 + $0x30] sm:$0xff]   ;;  %v869_v14 = vld [vmem:[#allocation5 + $0x28] sm:$0xff]   ;;  %v870_v15 = vld [vmem:[#allocation5 + $0x20] sm:$0xff]   ;;  %s275_s29 = scalar_lea.vmem [#allocation7], %s690_s20 }
  0x38   : > { %s280_s14 = scalar_lea.vmem %s1219_s0, %s692_s9  ;;  %v871_v16 = vld [vmem:[#allocation5 + $0x18] sm:$0xff]   ;;  %v872_v17 = vld [vmem:[#allocation5 + $0x10] sm:$0xff]   ;;  %v693_v18 = vld [vmem:[%s1221_s2] ss:$0 sm:$0xff]  ;;  %s598_s9 = sshll.u32 %s275_s29, 4  ;;  %s1172_s9 = int_to_ptr.vmem [resolvable:$true] %s598_s9 }
  0x39   : > { %v858_v4 = vld [vmem:[%s280_s14] sm:$0xff]   ;;  %v873_v28 = vld [vmem:[#allocation5 + $0x8] sm:$0xff]   ;;  %s1177_s13 = scalar_lea.hbm %s1225_s6, %s720_s10  ;;  %s1179_s14 = scalar_lea.sflag [#allocation4], %s273_s19 }
  0x3a   : > { %745 = vmatpush3.bf16.msra.mxu0 %v857_v2  ;;  %753 = vmatpush3.bf16.msra.mxu1 %v860_v5  ;;  %v874_v29 = vld [vmem:[#allocation5] sm:$0xff]   ;;  %s927_s15 = scalar_lea.vmem %s1172_s9, 256  ;;  %s1003_s25 = smov [#allocation7]  }
  0x3b   : > { %770 = vmatprep.subr.bf16.mxu0 %v1001_v0  ;;  %754 = vmatprep.subr.bf16.mxu1 %v1001_v0  ;;  %v706_v37 = vld [vmem:[%s1224_s5] ss:$0 sm:$0xff]  ;;  %p928_p10 = scmp.ne.s32.totalorder %s1172_s9, %s927_s15  ;;  %s931_s16 = sshll.u32 %s1003_s25, 4  ;;  %s932_s16 = int_to_ptr.vmem [resolvable:$false] %s931_s16 }
  0x3c   : > { %s933_s17 = scalar_lea.vmem %s932_s16, 512  ;;  %p934_p11 = scmp.lt.s32.totalorder %s1172_s9, %s932_s16 }
  0x3d   : > { %747 = vmatmul.mubr.msk.bf16.vlgmr.msra.gmra.mxu0 %vm314_vm1, %v858_v4  ;;  %p929_p12 = pnand %p928_p10, %p1079_p5  ;;  %p935_p0 = scmp.lt.s32.totalorder %s933_s17, %s927_s15 }
  0x3e   : > { %786 = vmatprep.mubr.msk.bf16.mxu0 %vm1002_vm0, %v1001_v0  ;;  %755 = vmatpush3.bf16.msra.mxu1 %v861_v6 }
  0x3f   : > { %756 = vmatprep.subr.bf16.mxu1 %v1001_v0  ;;  %771 = vmatpush3.bf16.msra.mxu0 %v867_v12  ;;  %p930_p8 = pneg %p929_p12  ;;  %p936_p1 = por %p935_p0, %p934_p11 }
  0x40   : > { %772 = vmatprep.subr.bf16.mxu0 %v1001_v0 }
  0x41   : > { %p937_p3 = pnand %p936_p1, %p930_p8 }
  0x42   : > { %757 = vmatpush3.bf16.msra.mxu1 %v862_v7 }
  0x43   : > { %758 = vmatprep.subr.bf16.mxu1 %v1001_v0  ;;  %773 = vmatpush3.bf16.msra.mxu0 %v868_v13 }
  0x44   : > { %774 = vmatprep.subr.bf16.mxu0 %v1001_v0 }
  0x46   : > { %759 = vmatpush3.bf16.msra.mxu1 %v863_v8 }
  0x47   : > { %760 = vmatprep.subr.bf16.mxu1 %v1001_v0  ;;  %775 = vmatpush3.bf16.msra.mxu0 %v869_v14 }
  0x48   : > { %776 = vmatprep.subr.bf16.mxu0 %v1001_v0 }
  0x4a   : > { %761 = vmatpush3.bf16.msra.mxu1 %v864_v9 }
  0x4b   : > { %762 = vmatprep.subr.bf16.mxu1 %v1001_v0  ;;  %777 = vmatpush3.bf16.msra.mxu0 %v870_v15 }
  0x4c   : > { %778 = vmatprep.subr.bf16.mxu0 %v1001_v0 }
  0x4e   : > { %763 = vmatpush3.bf16.msra.mxu1 %v865_v10 }
  0x4f   : > { %764 = vmatprep.subr.bf16.mxu1 %v1001_v0  ;;  %779 = vmatpush3.bf16.msra.mxu0 %v871_v16 }
  0x50   : > { %780 = vmatprep.subr.bf16.mxu0 %v1001_v0 }
  0x52   : > { %765 = vmatpush3.bf16.msra.mxu1 %v866_v11 }
  0x53   : > { %781 = vmatpush3.bf16.msra.mxu0 %v872_v17 }
  0x54   : > { %782 = vmatprep.subr.bf16.mxu0 %v1001_v0 }
  0x57   : > { %783 = vmatpush3.bf16.msra.mxu0 %v873_v28 }
  0x58   : > { %784 = vmatprep.subr.bf16.mxu0 %v1001_v0 }
  0x5b   : > { %785 = vmatpush3.bf16.msra.mxu0 %v874_v29 }
  0xfd   : > { %v352_v19 = vpop.f32.mrf.mxu0 }
  0xfe   : > { %v353_v21 = vadd.f32 %v693_v18, %v352_v19 }
  0xff   : > { %v748_v20 = vpop.f32.mrf.mxu0 }
 0x100   : > { %v359_v25 = vmax.f32 %v353_v21, 0.0 }
 0x101   : > { %v355_v22 = vpop.f32.mrf.mxu0 }
 0x102   : > { %v356_v23 = vadd.f32 %v693_v18, %v355_v22 }
 0x103   : > { %v749_v24 = vpop.f32.mrf.mxu0 }
 0x104   : > { %v360_v26 = vmax.f32 %v356_v23, 0.0 }
 0x106   : > { %v361_v27 = vpack.c.bf16 %v360_v26, %v359_v25 }
 0x108   : > { %767 = vmatmul.mubr.bf16.vlgmr.msra.gmra.mxu1 %v361_v27 }
 0x1c8   : > { %v460_v30 = vpop.f32.mrf.mxu1 }
 0x1c9   : > { %v467_v33 = vmax.f32 %v460_v30, 0.0 }
 0x1ca   : > { %v768_v31 = vpop.f32.mrf.mxu1 }
 0x1cc   : > { %v463_v32 = vpop.f32.mrf.mxu1 }
 0x1cd   : > { %v468_v34 = vmax.f32 %v463_v32, 0.0 }
 0x1ce   : > { %v769_v35 = vpop.f32.mrf.mxu1 }
 0x1cf   : > { %v469_v36 = vpack.c.bf16 %v468_v34, %v467_v33 }
 0x1d1   : > { %787 = vmatmul.mubr.bf16.vlgmr.msra.gmra.mxu0 %v469_v36 }
 0x291   : > { %v575_v38 = vpop.f32.mrf.mxu0 }
 0x292   : > { %v576_v39 = vadd.f32 %v706_v37, %v575_v38 }
 0x293   : > { %v788_v40 = vpop.f32.mrf.mxu0 }
 0x294   : > { %582 = vst [vmem:[%s275_s29] sm:$0xff] %v576_v39 }
 0x295   : > { %v578_v41 = vpop.f32.mrf.mxu0 }
 0x296   : > { %v579_v42 = vadd.f32 %v706_v37, %v578_v41 }
 0x297   : > { %v789_v43 = vpop.f32.mrf.mxu0 }
 0x298   : > { %583 = vst [vmem:[%s275_s29 + $0x8] sm:$0xff] %v579_v42 }
 0x299   : > { %940 = shalt.err (!%p937_p3)
}
 0x29a   : > { %s941_s18 = scalar_lea.hbm %s1177_s13, 256  ;;  %s945_s26 = scalar_lea.hbm %s1225_s6, 768 }
 0x29b   : > { %p942_p2 = scmp.ne.s32.totalorder %s1177_s13, %s941_s18  ;;  %p946_p7 = scmp.lt.s32.totalorder %s1177_s13, %s1225_s6 }
 0x29c   : > { %p947_p6 = scmp.lt.s32.totalorder %s945_s26, %s941_s18 }
 0x29d   : > { %p943_p4 = pnand %p942_p2, %p1079_p5 }
 0x29e   : > { %p948_p9 = por %p947_p6, %p946_p7 }
 0x29f   : > { %p944_p13 = pneg %p943_p4 }
 0x2a1   : > { %p949_p10 = pnand %p948_p9, %p944_p13 }
 0x2a3   : > { %952 = shalt.err (!%p949_p10)
}
 0x2a4   : > { %s1004_s10 = smov 128   ;;  %s1005_s11 = smov 8  }
 0x2a5   : > { %798 = dma.vmem_to_hbm [thread:$0]  (%p1079_p5), %s1172_s9, 256, %s1177_s13, %s1179_s14, %s1004_s10, %s1004_s10, %s1005_s11  }
 0x2a6 PF: > { %p815_p12 = scmp.ge.s32.totalorder %s995_s24, 2  ;;  %s613_s12 = sand.u32 1, %s983_s21  }
 0x2a7   : > { %p1235_p8 = scmp.ne.s32.totalorder %s1228_s8, 0  ;;  %s614_s15 = scalar_lea.sflag [#allocation4], %s613_s12 }
 0x2a9   : > { %p808_p11 = pnand %p815_p12, %p1235_p8 }
 0x2ab   : > { %p809_p0 = pneg %p808_p11 }
 0x2ad   : > { %978 = dma.done.wait (%p809_p0), %s614_s15, 256  }
 0x2ae   : > { %980 = vsyncadd (%p809_p0), %s614_s15, 4294967040  ;;  %p18_p1 = scmp.ge.s32.totalorder %s1066_s27, 5   ;;  %s1236_s21 = smov %s987_s22 }
 0x2af   : > { %s1237_s22 = smov %s991_s23  ;;  %s1238_s23 = smov %s1077_s30 }
 0x2b0   : > { %s1239_s24 = smov %s1066_s27  ;;  %20 = sbr.rel (!%p18_p1) target bundleno = 5 (0x5), region = 88 }
 0x2b5   :  { %619 = vsyncpa [#allocation3], 1 }
 0x2b6   :  { %621 = vsyncpa [#allocation3 + $0x1], 1 }
 0x2b7   :  { %622 = vsyncpa [#allocation6], 1 }
 0x2b8   :  { %623 = vsyncpa [#allocation4], 1 }
 0x2b9   :  { %625 = vsyncpa [#allocation4 + $0x1], 1 }

</bundles_post_ra>
